<compile_context>
chip_gen: v6e
topology: v6e:2x2x1
jax: 0.10.0
libtpu: 0.0.40
codegen_flags: <defaults>
</compile_context>

<pallas_src>
import jax
import jax.numpy as jnp
from jax.experimental import pallas as pl
from jax.experimental.pallas import tpu as pltpu

LEAKY_SLOPE = 0.01  # torch.nn.LeakyReLU default negative_slope


def _leaky_relu(x):
    return jnp.where(x >= 0, x, LEAKY_SLOPE * x)


def _round_up(x, m):
    return (x + m - 1) // m * m


# ------------------------------- kernel ------------------------------------

def rnd_kernel(x_ref, w1_ref, b1_ref, w2_ref, b2_ref, w3_ref, b3_ref, out_ref):
    H = w2_ref.shape[1]
    Lp = w3_ref.shape[2]          # 128-lane-aligned latent width
    wdt = w1_ref.dtype

    x = x_ref[...]                # (blk, S), compute dtype (f32 or bf16)

    # Layer 1: both networks fused along the output axis (one fat matmul):
    # (blk, S) @ (S, 2H) -> (blk, 2H), f32 accumulation, bias on f32.
    h1 = _leaky_relu(
        jnp.dot(x, w1_ref[...], preferred_element_type=jnp.float32) + b1_ref[...]
    ).astype(wdt)
    h1_t = h1[:, :H]              # target-network half (H kept lane-aligned at defaults)
    h1_p = h1[:, H:]              # predictor-network half

    # Layer 2: one matmul per network (stacked weights, no wasted FLOPs).
    h2_t = _leaky_relu(
        jnp.dot(h1_t, w2_ref[0], preferred_element_type=jnp.float32) + b2_ref[0]
    ).astype(wdt)
    h2_p = _leaky_relu(
        jnp.dot(h1_p, w2_ref[1], preferred_element_type=jnp.float32) + b2_ref[1]
    ).astype(wdt)

    # Layer 3: no zero-padded columns; each network's result goes straight
    # into its own 128-lane-aligned slab of the lane-dense output block.
    out_t = jnp.dot(h2_t, w3_ref[0], preferred_element_type=jnp.float32) + b3_ref[0]
    out_p = jnp.dot(h2_p, w3_ref[1], preferred_element_type=jnp.float32) + b3_ref[1]
    out_ref[:, :Lp] = out_t.astype(out_ref.dtype)
    out_ref[:, Lp:] = out_p.astype(out_ref.dtype)


# ---------------------------- parameter packing -----------------------------

def pack_rnd_params(target_params, predictor_params, compute_dtype=jnp.float32):
    """Pack both networks' weights ONCE (hoist out of the per-forward path).

    Each params tuple is (w1, b1, w2, b2, w3, b3) with weights (in, out) and
    biases (1, out). Returns a dict reusable across many forward calls.
    """
    tw1, tb1, tw2, tb2, tw3, tb3 = target_params
    pw1, pb1, pw2, pb2, pw3, pb3 = predictor_params
    H = tw1.shape[1]
    L = tw3.shape[1]
    Lp = _round_up(L, 128)

    w1 = jnp.concatenate([tw1, pw1], axis=1).astype(compute_dtype)     # (S, 2H)
    b1 = jnp.concatenate([tb1, pb1], axis=1).astype(jnp.float32)       # (1, 2H)
    w2 = jnp.stack([tw2, pw2], axis=0).astype(compute_dtype)           # (2, H, H)
    b2 = jnp.stack([tb2, pb2], axis=0).astype(jnp.float32)             # (2, 1, H)

    # Layer-3 padded only to the 128-lane boundary (no 2x zero-column waste).
    w3 = jnp.stack([tw3, pw3], axis=0).astype(compute_dtype)           # (2, H, L)
    b3 = jnp.stack([tb3, pb3], axis=0).astype(jnp.float32)             # (2, 1, L)
    if Lp != L:
        w3 = jnp.pad(w3, ((0, 0), (0, 0), (0, Lp - L)))
        b3 = jnp.pad(b3, ((0, 0), (0, 0), (0, Lp - L)))

    return {"arrays": (w1, b1, w2, b2, w3, b3), "latent_dim": L}


# ------------------------------- tiling ------------------------------------

def _blk_cap_from_vmem(S, H, Lp, cbytes, budget=28 << 20, cap_rows=2048):
    """Largest batch block (multiple of 16) whose VMEM footprint fits budget."""
    # Single-buffered weights (pl.Buffered(1)) + f32 biases.
    fixed = (S * 2 * H + 2 * H * H + 2 * H * Lp) * cbytes + (4 * H + 2 * Lp) * 4
    per_row = (2 * S * cbytes            # x block, double-buffered
               + 4 * Lp * cbytes         # out block (2*Lp wide), double-buffered
               + 2 * H * (4 + cbytes)    # h1 f32 accumulator + cast copy
               + 2 * H * 4               # h2_t / h2_p f32
               + 2 * Lp * 4)             # out_t / out_p f32
    blk = (budget - fixed) // per_row
    blk = int(max(16, min(cap_rows, (blk // 16) * 16)))
    return blk, fixed, per_row


def _choose_tiling(B, blk_cap):
    """Pick (block_b, padded_B). Even step count when split (v7x dual-TC)."""
    if B <= 32:                         # too small to split usefully
        blk = _round_up(B, 8)
        return blk, blk
    steps = max(2, -(-B // blk_cap))
    if steps % 2:
        steps += 1                      # balanced sharding across 2 TensorCores
    blk = _round_up(-(-B // steps), 16)
    return blk, blk * steps


# ------------------------------- forward -----------------------------------

def rnd_forward(next_state, packed, *, block_b=None):
    """Pallas equivalent of RND.forward using pre-packed parameters.

    next_state: (B, state_dim) float32
    packed: result of pack_rnd_params(...)
    Returns (random_phi_s_next, predicted_phi_s_next), each (B, latent_dim)
    in the packed compute dtype.
    """
    w1, b1, w2, b2, w3, b3 = packed["arrays"]
    L = packed["latent_dim"]
    compute_dtype = w1.dtype
    cbytes = jnp.dtype(compute_dtype).itemsize

    B, S = next_state.shape
    H = w2.shape[1]
    Lp = w3.shape[2]

    blk_cap, fixed_bytes, per_row_bytes = _blk_cap_from_vmem(S, H, Lp, cbytes)
    if block_b is None:
        block_b, B_pad = _choose_tiling(B, blk_cap)
    else:
        B_pad = _round_up(B, block_b)
    steps = B_pad // block_b

    x = next_state.astype(compute_dtype)
    if B_pad != B:
        x = jnp.pad(x, ((0, B_pad - B), (0, 0)))

    xmap = lambda i: (i, 0)
    rep2 = lambda i: (0, 0)
    rep3 = lambda i: (0, 0, 0)
    single = pl.Buffered(1)   # grid-constant weights: no double-buffer copy

    in_specs = [
        pl.BlockSpec((block_b, S), xmap),
        pl.BlockSpec((S, 2 * H), rep2, pipeline_mode=single),
        pl.BlockSpec((1, 2 * H), rep2, pipeline_mode=single),
        pl.BlockSpec((2, H, H), rep3, pipeline_mode=single),
        pl.BlockSpec((2, 1, H), rep3, pipeline_mode=single),
        pl.BlockSpec((2, H, Lp), rep3, pipeline_mode=single),
        pl.BlockSpec((2, 1, Lp), rep3, pipeline_mode=single),
    ]
    out_specs = pl.BlockSpec((block_b, 2 * Lp), xmap)
    out_shape = jax.ShapeDtypeStruct((B_pad, 2 * Lp), compute_dtype)

    grid_spec = pltpu.PrefetchScalarGridSpec(
        num_scalar_prefetch=0,
        grid=(steps,),
        in_specs=in_specs,
        out_specs=out_specs,
    )

    vmem_est = fixed_bytes + block_b * per_row_bytes
    vmem_limit = int(min(max(int(vmem_est * 1.25), 16 << 20), 40 << 20))

    flops = 2 * B_pad * (S * 2 * H + 2 * H * H + 2 * H * Lp)
    bytes_accessed = int(B_pad * S * cbytes + fixed_bytes + B_pad * 2 * Lp * cbytes)
    cost = pl.CostEstimate(flops=flops, transcendentals=0,
                           bytes_accessed=bytes_accessed)

    out = pl.pallas_call(
        rnd_kernel,
        grid_spec=grid_spec,
        out_shape=out_shape,
        compiler_params=pltpu.CompilerParams(
            dimension_semantics=("parallel",),
            vmem_limit_bytes=vmem_limit),
        cost_estimate=cost,
    )(x, w1, b1, w2, b2, w3, b3)

    # One contiguous reshape + a single slice (drops batch padding and lane
    # padding), then split into the module's two return values.
    latents = out.reshape(B_pad, 2, Lp)[:B, :, :L]
    return latents[:, 0], latents[:, 1]


# ----------------------------- test harness --------------------------------

def init_linear(key, in_dim, out_dim):
    """Deterministic init mimicking nn.Linear's U(-1/sqrt(in), 1/sqrt(in))."""
    kw, kb = jax.random.split(key)
    bound = 1.0 / jnp.sqrt(jnp.float32(in_dim))
    w = jax.random.uniform(kw, (in_dim, out_dim), jnp.float32, -bound, bound)
    b = jax.random.uniform(kb, (1, out_dim), jnp.float32, -bound, bound)
    return w, b


def init_mlp(key, state_dim, hidden_dim, latent_dim):
    k1, k2, k3 = jax.random.split(key, 3)
    w1, b1 = init_linear(k1, state_dim, hidden_dim)
    w2, b2 = init_linear(k2, hidden_dim, hidden_dim)
    w3, b3 = init_linear(k3, hidden_dim, latent_dim)
    return (w1, b1, w2, b2, w3, b3)


def reference_forward(x, params):
    w1, b1, w2, b2, w3, b3 = params
    h1 = jax.nn.leaky_relu(x @ w1 + b1, LEAKY_SLOPE)
    h2 = jax.nn.leaky_relu(h1 @ w2 + b2, LEAKY_SLOPE)
    return h2 @ w3 + b3


if __name__ == "__main__":
    # Small shapes consistent with the module's forward (real defaults are
    # hidden=256, latent=128; kept small here for the smoke test).
    batch, state_dim, hidden_dim, latent_dim = 16, 16, 32, 16

    key = jax.random.PRNGKey(0)
    k_x, k_t, k_p, k_x2 = jax.random.split(key, 4)

    next_state = jax.random.normal(k_x, (batch, state_dim), jnp.float32)
    target_params = init_mlp(k_t, state_dim, hidden_dim, latent_dim)
    predictor_params = init_mlp(k_p, state_dim, hidden_dim, latent_dim)

    rand_ref = reference_forward(next_state, target_params)
    pred_ref = reference_forward(next_state, predictor_params)

    # f32 path (matches the PyTorch module's numerics). Weights packed once.
    packed_f32 = pack_rnd_params(target_params, predictor_params)
    rand_phi, pred_phi = rnd_forward(next_state, packed_f32)
    rand_phi, pred_phi = jax.block_until_ready((rand_phi, pred_phi))
    assert rand_phi.shape == (batch, latent_dim)
    assert pred_phi.shape == (batch, latent_dim)
    assert jnp.allclose(rand_phi, rand_ref, atol=1e-5, rtol=1e-5)
    assert jnp.allclose(pred_phi, pred_ref, atol=1e-5, rtol=1e-5)

    # Awkward batch size: exercises batch padding + even multi-step grid.
    batch2 = 50
    next_state2 = jax.random.normal(k_x2, (batch2, state_dim), jnp.float32)
    r2, p2 = jax.block_until_ready(rnd_forward(next_state2, packed_f32))
    assert r2.shape == (batch2, latent_dim) and p2.shape == (batch2, latent_dim)
    assert jnp.allclose(r2, reference_forward(next_state2, target_params),
                        atol=1e-5, rtol=1e-5)
    assert jnp.allclose(p2, reference_forward(next_state2, predictor_params),
                        atol=1e-5, rtol=1e-5)

    # bf16 weights/activations/output with f32 MXU accumulation; checked
    # loosely against the f32 reference (intentionally not bit-matching).
    packed_bf16 = pack_rnd_params(target_params, predictor_params,
                                  compute_dtype=jnp.bfloat16)
    rand_bf, pred_bf = jax.block_until_ready(rnd_forward(next_state, packed_bf16))
    assert jnp.allclose(rand_bf.astype(jnp.float32), rand_ref, atol=1e-1, rtol=1e-1)
    assert jnp.allclose(pred_bf.astype(jnp.float32), pred_ref, atol=1e-1, rtol=1e-1)

    print("KERNEL_OK")
</pallas_src>

<mosaic_0001>
module attributes {stable_mosaic.version = 11 : i64} {
  func.func @rnd_kernel(%arg0: i32, %arg1: memref<16x16xf32, #tpu.memory_space<vmem>>, %arg2: memref<16x64xf32, #tpu.memory_space<vmem>>, %arg3: memref<1x64xf32, #tpu.memory_space<vmem>>, %arg4: memref<2x32x32xf32, #tpu.memory_space<vmem>>, %arg5: memref<2x1x32xf32, #tpu.memory_space<vmem>>, %arg6: memref<2x32x128xf32, #tpu.memory_space<vmem>>, %arg7: memref<2x1x128xf32, #tpu.memory_space<vmem>>, %arg8: memref<16x256xf32, #tpu.memory_space<vmem>>) attributes {dimension_semantics = [#tpu.dimension_semantics<parallel>], iteration_bounds = array<i64: 1>, scalar_prefetch = 0 : i64, scratch_operands = 0 : i64, tpu.core_type = #tpu.core_type<tc>, window_params = [{transform_indices = @transform_0, window_bounds = array<i64: 16, 16>}, {pipeline_mode = #tpu.pipeline_mode<synchronous>, transform_indices = @transform_1, window_bounds = array<i64: 16, 64>}, {pipeline_mode = #tpu.pipeline_mode<synchronous>, transform_indices = @transform_2, window_bounds = array<i64: 1, 64>}, {pipeline_mode = #tpu.pipeline_mode<synchronous>, transform_indices = @transform_3, window_bounds = array<i64: 2, 32, 32>}, {pipeline_mode = #tpu.pipeline_mode<synchronous>, transform_indices = @transform_4, window_bounds = array<i64: 2, 1, 32>}, {pipeline_mode = #tpu.pipeline_mode<synchronous>, transform_indices = @transform_5, window_bounds = array<i64: 2, 32, 128>}, {pipeline_mode = #tpu.pipeline_mode<synchronous>, transform_indices = @transform_6, window_bounds = array<i64: 2, 1, 128>}, {transform_indices = @transform_7, window_bounds = array<i64: 16, 256>}]} {
    %c0 = arith.constant 0 : index
    %c0_0 = arith.constant 0 : index
    %0 = vector.load %arg1[%c0, %c0_0] : memref<16x16xf32, #tpu.memory_space<vmem>>, vector<16x16xf32>
    %c0_1 = arith.constant 0 : index
    %c0_2 = arith.constant 0 : index
    %1 = vector.load %arg2[%c0_1, %c0_2] : memref<16x64xf32, #tpu.memory_space<vmem>>, vector<16x64xf32>
    %cst = arith.constant dense<0.000000e+00> : vector<16x64xf32>
    %2 = tpu.matmul %0, %1, %cst {dimension_numbers = #tpu.dot_dimension_numbers<[1], [0], [0], [1], [0, 0, 1, 1], [], []>} : vector<16x16xf32>, vector<16x64xf32>, vector<16x64xf32> -> vector<16x64xf32>
    %c0_3 = arith.constant 0 : index
    %c0_4 = arith.constant 0 : index
    %3 = vector.load %arg3[%c0_3, %c0_4] : memref<1x64xf32, #tpu.memory_space<vmem>>, vector<1x64xf32>
    %4 = vector.broadcast %3 : vector<1x64xf32> to vector<16x64xf32>
    %5 = arith.addf %2, %4 : vector<16x64xf32>
    %cst_5 = arith.constant 0.000000e+00 : f32
    %6 = vector.broadcast %cst_5 : f32 to vector<16x64xf32>
    %7 = arith.cmpf oge, %5, %6 : vector<16x64xf32>
    %cst_6 = arith.constant 0.00999999977 : f32
    %8 = vector.broadcast %cst_6 : f32 to vector<16x64xf32>
    %9 = arith.mulf %8, %5 : vector<16x64xf32>
    %10 = arith.select %7, %5, %9 : vector<16x64xi1>, vector<16x64xf32>
    %11 = vector.extract_strided_slice %10 {offsets = [0, 0], sizes = [16, 32], strides = [1, 1]} : vector<16x64xf32> to vector<16x32xf32>
    %12 = vector.extract_strided_slice %10 {offsets = [0, 32], sizes = [16, 32], strides = [1, 1]} : vector<16x64xf32> to vector<16x32xf32>
    %c0_7 = arith.constant 0 : index
    %c0_8 = arith.constant 0 : index
    %c0_9 = arith.constant 0 : index
    %13 = vector.load %arg4[%c0_7, %c0_8, %c0_9] : memref<2x32x32xf32, #tpu.memory_space<vmem>>, vector<1x32x32xf32>
    %14 = vector.shape_cast %13 : vector<1x32x32xf32> to vector<32x32xf32>
    %cst_10 = arith.constant dense<0.000000e+00> : vector<16x32xf32>
    %15 = tpu.matmul %11, %14, %cst_10 {dimension_numbers = #tpu.dot_dimension_numbers<[1], [0], [0], [1], [0, 0, 1, 1], [], []>} : vector<16x32xf32>, vector<32x32xf32>, vector<16x32xf32> -> vector<16x32xf32>
    %c0_11 = arith.constant 0 : index
    %c0_12 = arith.constant 0 : index
    %c0_13 = arith.constant 0 : index
    %16 = vector.load %arg5[%c0_11, %c0_12, %c0_13] : memref<2x1x32xf32, #tpu.memory_space<vmem>>, vector<1x1x32xf32>
    %17 = vector.shape_cast %16 : vector<1x1x32xf32> to vector<1x32xf32>
    %18 = vector.broadcast %17 : vector<1x32xf32> to vector<16x32xf32>
    %19 = arith.addf %15, %18 : vector<16x32xf32>
    %cst_14 = arith.constant 0.000000e+00 : f32
    %20 = vector.broadcast %cst_14 : f32 to vector<16x32xf32>
    %21 = arith.cmpf oge, %19, %20 : vector<16x32xf32>
    %cst_15 = arith.constant 0.00999999977 : f32
    %22 = vector.broadcast %cst_15 : f32 to vector<16x32xf32>
    %23 = arith.mulf %22, %19 : vector<16x32xf32>
    %24 = arith.select %21, %19, %23 : vector<16x32xi1>, vector<16x32xf32>
    %c1 = arith.constant 1 : index
    %c0_16 = arith.constant 0 : index
    %c0_17 = arith.constant 0 : index
    %25 = vector.load %arg4[%c1, %c0_16, %c0_17] : memref<2x32x32xf32, #tpu.memory_space<vmem>>, vector<1x32x32xf32>
    %26 = vector.shape_cast %25 : vector<1x32x32xf32> to vector<32x32xf32>
    %cst_18 = arith.constant dense<0.000000e+00> : vector<16x32xf32>
    %27 = tpu.matmul %12, %26, %cst_18 {dimension_numbers = #tpu.dot_dimension_numbers<[1], [0], [0], [1], [0, 0, 1, 1], [], []>} : vector<16x32xf32>, vector<32x32xf32>, vector<16x32xf32> -> vector<16x32xf32>
    %c1_19 = arith.constant 1 : index
    %c0_20 = arith.constant 0 : index
    %c0_21 = arith.constant 0 : index
    %28 = vector.load %arg5[%c1_19, %c0_20, %c0_21] : memref<2x1x32xf32, #tpu.memory_space<vmem>>, vector<1x1x32xf32>
    %29 = vector.shape_cast %28 : vector<1x1x32xf32> to vector<1x32xf32>
    %30 = vector.broadcast %29 : vector<1x32xf32> to vector<16x32xf32>
    %31 = arith.addf %27, %30 : vector<16x32xf32>
    %cst_22 = arith.constant 0.000000e+00 : f32
    %32 = vector.broadcast %cst_22 : f32 to vector<16x32xf32>
    %33 = arith.cmpf oge, %31, %32 : vector<16x32xf32>
    %cst_23 = arith.constant 0.00999999977 : f32
    %34 = vector.broadcast %cst_23 : f32 to vector<16x32xf32>
    %35 = arith.mulf %34, %31 : vector<16x32xf32>
    %36 = arith.select %33, %31, %35 : vector<16x32xi1>, vector<16x32xf32>
    %c0_24 = arith.constant 0 : index
    %c0_25 = arith.constant 0 : index
    %c0_26 = arith.constant 0 : index
    %37 = vector.load %arg6[%c0_24, %c0_25, %c0_26] : memref<2x32x128xf32, #tpu.memory_space<vmem>>, vector<1x32x128xf32>
    %38 = vector.shape_cast %37 : vector<1x32x128xf32> to vector<32x128xf32>
    %cst_27 = arith.constant dense<0.000000e+00> : vector<16x128xf32>
    %39 = tpu.matmul %24, %38, %cst_27 {dimension_numbers = #tpu.dot_dimension_numbers<[1], [0], [0], [1], [0, 0, 1, 1], [], []>} : vector<16x32xf32>, vector<32x128xf32>, vector<16x128xf32> -> vector<16x128xf32>
    %c0_28 = arith.constant 0 : index
    %c0_29 = arith.constant 0 : index
    %c0_30 = arith.constant 0 : index
    %40 = vector.load %arg7[%c0_28, %c0_29, %c0_30] : memref<2x1x128xf32, #tpu.memory_space<vmem>>, vector<1x1x128xf32>
    %41 = vector.shape_cast %40 : vector<1x1x128xf32> to vector<1x128xf32>
    %42 = vector.broadcast %41 : vector<1x128xf32> to vector<16x128xf32>
    %43 = arith.addf %39, %42 : vector<16x128xf32>
    %c1_31 = arith.constant 1 : index
    %c0_32 = arith.constant 0 : index
    %c0_33 = arith.constant 0 : index
    %44 = vector.load %arg6[%c1_31, %c0_32, %c0_33] : memref<2x32x128xf32, #tpu.memory_space<vmem>>, vector<1x32x128xf32>
    %45 = vector.shape_cast %44 : vector<1x32x128xf32> to vector<32x128xf32>
    %cst_34 = arith.constant dense<0.000000e+00> : vector<16x128xf32>
    %46 = tpu.matmul %36, %45, %cst_34 {dimension_numbers = #tpu.dot_dimension_numbers<[1], [0], [0], [1], [0, 0, 1, 1], [], []>} : vector<16x32xf32>, vector<32x128xf32>, vector<16x128xf32> -> vector<16x128xf32>
    %c1_35 = arith.constant 1 : index
    %c0_36 = arith.constant 0 : index
    %c0_37 = arith.constant 0 : index
    %47 = vector.load %arg7[%c1_35, %c0_36, %c0_37] : memref<2x1x128xf32, #tpu.memory_space<vmem>>, vector<1x1x128xf32>
    %48 = vector.shape_cast %47 : vector<1x1x128xf32> to vector<1x128xf32>
    %49 = vector.broadcast %48 : vector<1x128xf32> to vector<16x128xf32>
    %50 = arith.addf %46, %49 : vector<16x128xf32>
    %c0_38 = arith.constant 0 : index
    %c0_39 = arith.constant 0 : index
    %51 = vector.load %arg8[%c0_38, %c0_39] : memref<16x256xf32, #tpu.memory_space<vmem>>, vector<16x128xf32>
    tpu.vector_store %arg8[%c0_38, %c0_39], %43 {strides = array<i32>} : memref<16x256xf32, #tpu.memory_space<vmem>>, vector<16x128xf32>,
    %c0_40 = arith.constant 0 : index
    %c128 = arith.constant 128 : index
    %52 = vector.load %arg8[%c0_40, %c128] : memref<16x256xf32, #tpu.memory_space<vmem>>, vector<16x128xf32>
    tpu.vector_store %arg8[%c0_40, %c128], %50 {strides = array<i32>} : memref<16x256xf32, #tpu.memory_space<vmem>>, vector<16x128xf32>,
    return
  }
  func.func @transform_0(%arg0: i32) -> (i32, i32) {
    %c0_i32 = arith.constant 0 : i32
    %c0_i32_0 = arith.constant 0 : i32
    return %arg0, %c0_i32 : i32, i32
  }
  func.func @transform_1(%arg0: i32) -> (i32, i32) {
    %c0_i32 = arith.constant 0 : i32
    %c0_i32_0 = arith.constant 0 : i32
    %c0_i32_1 = arith.constant 0 : i32
    return %c0_i32, %c0_i32_0 : i32, i32
  }
  func.func @transform_2(%arg0: i32) -> (i32, i32) {
    %c0_i32 = arith.constant 0 : i32
    %c0_i32_0 = arith.constant 0 : i32
    %c0_i32_1 = arith.constant 0 : i32
    return %c0_i32, %c0_i32_0 : i32, i32
  }
  func.func @transform_3(%arg0: i32) -> (i32, i32, i32) {
    %c0_i32 = arith.constant 0 : i32
    %c0_i32_0 = arith.constant 0 : i32
    %c0_i32_1 = arith.constant 0 : i32
    %c0_i32_2 = arith.constant 0 : i32
    return %c0_i32, %c0_i32_0, %c0_i32_1 : i32, i32, i32
  }
  func.func @transform_4(%arg0: i32) -> (i32, i32, i32) {
    %c0_i32 = arith.constant 0 : i32
    %c0_i32_0 = arith.constant 0 : i32
    %c0_i32_1 = arith.constant 0 : i32
    %c0_i32_2 = arith.constant 0 : i32
    return %c0_i32, %c0_i32_0, %c0_i32_1 : i32, i32, i32
  }
  func.func @transform_5(%arg0: i32) -> (i32, i32, i32) {
    %c0_i32 = arith.constant 0 : i32
    %c0_i32_0 = arith.constant 0 : i32
    %c0_i32_1 = arith.constant 0 : i32
    %c0_i32_2 = arith.constant 0 : i32
    return %c0_i32, %c0_i32_0, %c0_i32_1 : i32, i32, i32
  }
  func.func @transform_6(%arg0: i32) -> (i32, i32, i32) {
    %c0_i32 = arith.constant 0 : i32
    %c0_i32_0 = arith.constant 0 : i32
    %c0_i32_1 = arith.constant 0 : i32
    %c0_i32_2 = arith.constant 0 : i32
    return %c0_i32, %c0_i32_0, %c0_i32_1 : i32, i32, i32
  }
  func.func @transform_7(%arg0: i32) -> (i32, i32) {
    %c0_i32 = arith.constant 0 : i32
    %c0_i32_0 = arith.constant 0 : i32
    return %arg0, %c0_i32 : i32, i32
  }
}

</mosaic_0001>

<bundles_post_ra>
// kernel: tpu_custom_call.1
= control target key start
LH: loop header
LB: loop body
LE: loop exit
PB: predicated region body
PF: predicated region fallthrough
CT: control target
= control target key end

     0   :  { %12 = vsyncpa [#allocation3], 0  ;;  %s905_s0 = inlined_call_operand.hbm [shape: f32[16,16], index: 0, kind: input, shape index: {}]   ;;  %s906_s1 = inlined_call_operand.hbm [shape: f32[16,64], index: 1, kind: input, shape index: {}]   ;;  %s907_s2 = inlined_call_operand.vmem [shape: f32[1,64], index: 2, kind: input, shape index: {}]   ;;  %s908_s3 = inlined_call_operand.hbm [shape: f32[2,32,32], index: 3, kind: input, shape index: {}]   ;;  %s909_s4 = inlined_call_operand.vmem [shape: f32[2,1,32], index: 4, kind: input, shape index: {}]   ;;  %s910_s5 = inlined_call_operand.hbm [shape: f32[2,32,128], index: 5, kind: input, shape index: {}]   ;;  %s911_s6 = inlined_call_operand.vmem [shape: f32[2,1,128], index: 6, kind: input, shape index: {}]   ;;  %s912_s7 = inlined_call_operand.hbm [shape: f32[16,256], index: 7, kind: output, shape index: {}]  }
   0x1   :  { %13 = vsyncpa [#allocation6], 0 }
   0x2   :  { %14 = vsyncpa [#allocation9], 0 }
   0x3   :  { %15 = vsyncpa [#allocation4], 0  ;;  %s805_s24 = smov [#allocation5]   ;;  %s806_s26 = smov [#allocation2]  }
   0x4   :  { %s33_s25 = sshll.u32 %s805_s24, 4  ;;  %s21_s27 = sshll.u32 %s806_s26, 4  ;;  %s34_s25 = int_to_ptr.vmem [resolvable:$true] %s33_s25  ;;  %s22_s27 = int_to_ptr.vmem [resolvable:$true] %s21_s27 }
   0x5   :  { %s705_s28 = scalar_lea.vmem %s34_s25, 256  ;;  %p710_p1 = scmp.lt.s32.totalorder %s34_s25, %s34_s25 }
   0x6   :  { %p706_p0 = scmp.ne.s32.totalorder %s34_s25, %s705_s28  ;;  %p711_p2 = scmp.lt.s32.totalorder %s705_s28, %s705_s28 }
   0x8   :  { %p712_p3 = por %p711_p2, %p710_p1 }
   0xa   :  { %p713_p4 = pnand %p712_p3, %p706_p0 }
   0xc   :  { %716 = shalt.err (!%p713_p4)
}
   0xd   :  { %s807_s29 = smov 128   ;;  %s808_s30 = smov 8  }
   0xe   :  { %39 = dma.hbm_to_vmem [thread:$0]  %s906_s1, 256, %s34_s25, [#allocation6], %s807_s29, %s807_s29, %s808_s30  }
   0xf   :  { %s725_s10 = scalar_lea.vmem %s22_s27, 256  ;;  %p730_p6 = scmp.lt.s32.totalorder %s22_s27, %s22_s27 }
  0x10   :  { %p726_p5 = scmp.ne.s32.totalorder %s22_s27, %s725_s10  ;;  %p731_p7 = scmp.lt.s32.totalorder %s725_s10, %s725_s10 }
  0x12   :  { %p732_p8 = por %p731_p7, %p730_p6 }
  0x14   :  { %p733_p9 = pnand %p732_p8, %p726_p5 }
  0x16   :  { %736 = shalt.err (!%p733_p9)
}
  0x17   :  { %27 = dma.hbm_to_vmem [thread:$0]  %s905_s0, 256, %s22_s27, [#allocation3], %s807_s29, %s807_s29, %s808_s30  }
  0x18   :  { %s809_s13 = smov [#allocation7]   ;;  %s810_s15 = smov [#allocation8]  }
  0x19   :  { %s47_s14 = sshll.u32 %s809_s13, 4  ;;  %s61_s16 = sshll.u32 %s810_s15, 4  ;;  %s48_s14 = int_to_ptr.vmem [resolvable:$true] %s47_s14  ;;  %s62_s16 = int_to_ptr.vmem [resolvable:$true] %s61_s16 }
  0x1a   :  { %s745_s1 = scalar_lea.vmem %s48_s14, 1024  ;;  %p750_p11 = scmp.lt.s32.totalorder %s48_s14, %s48_s14 }
  0x1b   :  { %p746_p10 = scmp.ne.s32.totalorder %s48_s14, %s745_s1  ;;  %p751_p12 = scmp.lt.s32.totalorder %s745_s1, %s745_s1 }
  0x1d   :  { %p752_p13 = por %p751_p12, %p750_p11 }
  0x1f   :  { %p753_p0 = pnand %p752_p13, %p746_p10 }
  0x21   :  { %756 = shalt.err (!%p753_p0)
}
  0x22   :  { %53 = dma.hbm_to_vmem [thread:$0]  %s908_s3, 1024, %s48_s14, [#allocation6], %s807_s29, %s807_s29, %s808_s30  }
  0x23   :  { %s765_s0 = scalar_lea.vmem %s62_s16, 1024  ;;  %p770_p2 = scmp.lt.s32.totalorder %s62_s16, %s62_s16 }
  0x24   :  { %p766_p1 = scmp.ne.s32.totalorder %s62_s16, %s765_s0  ;;  %p771_p3 = scmp.lt.s32.totalorder %s765_s0, %s765_s0 }
  0x26   :  { %p772_p4 = por %p771_p3, %p770_p2 }
  0x28   :  { %p773_p5 = pnand %p772_p4, %p766_p1 }
  0x2a   :  { %776 = shalt.err (!%p773_p5)
}
  0x2b   :  { %67 = dma.hbm_to_vmem [thread:$0]  %s910_s5, 1024, %s62_s16, [#allocation9], %s807_s29, %s807_s29, %s808_s30  }
  0x2c   :  { %797 = dma.done.wait [#allocation3], 256  }
  0x2d   :  { %798 = vsyncadd [#allocation3], 4294967040 }
  0x2e   :  { %799 = dma.done.wait [#allocation6], 1280  }
  0x2f   :  { %800 = vsyncadd [#allocation6], 4294966016 }
  0x30   :  { %801 = dma.done.wait [#allocation9], 1024  }
  0x31   :  { %802 = vsyncadd [#allocation9], 4294966272  ;;  %vm93_vm0 = vcmask 130048   ;;  %v85_v0 = vld [vmem:[#allocation5 + $0x8] sm:$0xff]  ;;  %v84_v1 = vld [vmem:[#allocation5] sm:$0xff]  ;;  %vm192_vm3 = vcmask 261120  }
  0x32   :  { %v82_v2 = vld [vmem:[#allocation2] sm:$0xff]  ;;  %636 = vmatprep.subr.mxu0 %v85_v0  ;;  %v83_v3 = vld [vmem:[#allocation2 + $0x8] sm:$0xff]  ;;  %v184_v4 = vld [vmem:[#allocation7 + $0x18] sm:$0xff]  ;;  %s811_s21 = smov 96   ;;  %s812_s28 = smov [#allocation10]  }
  0x33   :  { %640 = vmatprep.mubr.msk.f32.mxu0 %vm93_vm0, %v82_v2  ;;  %637 = vmatpush3.msra.mxu0 %v85_v0  ;;  %v183_v5 = vld [vmem:[#allocation7 + $0x10] sm:$0xff]  ;;  %v182_v6 = vld [vmem:[#allocation7 + $0x8] sm:$0xff]  ;;  %v181_v7 = vld [vmem:[#allocation7] sm:$0xff]  ;;  %s577_s29 = sshll.u32 %s812_s28, 4  ;;  %s578_s29 = int_to_ptr.vmem [resolvable:$true] %s577_s29 }
  0x34   :  { %638 = vmatprep.subr.mxu0 %v84_v1  ;;  %643 = vmatprep.subr.mxu1 %v184_v4  ;;  %v284_v8 = vld [vmem:[#allocation7 + $0x38] sm:$0xff]  ;;  %v283_v9 = vld [vmem:[#allocation7 + $0x30] sm:$0xff]  ;;  %v282_v10 = vld [vmem:[#allocation7 + $0x28] sm:$0xff]  ;;  %s777_s30 = scalar_lea.vmem %s578_s29, 512  ;;  %p782_p7 = scmp.lt.s32.totalorder %s578_s29, %s578_s29 }
  0x35   :  { %639 = vmatpush3.msra.mxu0 %v84_v1  ;;  %644 = vmatpush3.msra.mxu1 %v184_v4  ;;  %v281_v11 = vld [vmem:[#allocation7 + $0x20] sm:$0xff]  ;;  %v385_v21 = vld [vmem:[#allocation8 + $0x18] sm:$0xff]  ;;  %v384_v22 = vld [vmem:[#allocation8 + $0x10] sm:$0xff]  ;;  %p778_p6 = scmp.ne.s32.totalorder %s578_s29, %s777_s30  ;;  %p783_p8 = scmp.lt.s32.totalorder %s777_s30, %s777_s30 }
  0x36   :  { %641 = vmatmul.mubr.msk.f32.vlgmr.msra.gmra.mxu0 %vm93_vm0, %v83_v3  ;;  %645 = vmatprep.subr.mxu1 %v183_v5  ;;  %v591_v12 = vld [vmem:[%s907_s2] ss:$0 sm:$0xff]  ;;  %v383_v23 = vld [vmem:[#allocation8 + $0x8] sm:$0xff]  ;;  %v478_v27 = vld [vmem:[#allocation8 + $0x38] sm:$0xff] }
  0x37   :  { %646 = vmatpush3.msra.mxu1 %v183_v5  ;;  %654 = vmatprep.subr.mxu0 %v284_v8  ;;  %v382_v24 = vld [vmem:[#allocation8] sm:$0xff]  ;;  %v477_v28 = vld [vmem:[#allocation8 + $0x30] sm:$0xff]  ;;  %v476_v29 = vld [vmem:[#allocation8 + $0x28] sm:$0xff]  ;;  %p784_p9 = por %p783_p8, %p782_p7 }
  0x38   :  { %647 = vmatprep.subr.mxu1 %v182_v6  ;;  %655 = vmatpush3.msra.mxu0 %v284_v8  ;;  %v475_v30 = vld [vmem:[#allocation8 + $0x20] sm:$0xff] }
  0x39   :  { %648 = vmatpush3.msra.mxu1 %v182_v6  ;;  %656 = vmatprep.subr.mxu0 %v283_v9  ;;  %v594_v31 = vld [vmem:[%s909_s4] ss:$0 sm:$0xff]  ;;  %v598_v40 = vld [vmem:[%s909_s4 + $0x1] ss:$0 sm:$0xff]  ;;  %p785_p10 = pnand %p784_p9, %p778_p6 }
  0x3a   :  { %649 = vmatprep.subr.mxu1 %v181_v7  ;;  %657 = vmatpush3.msra.mxu0 %v283_v9  ;;  %v601_v49 = vld [vmem:[%s911_s6] ss:$0 sm:$0xff]  ;;  %v605_v54 = vld [vmem:[%s911_s6 + $0x1] ss:$0 sm:$0xff] }
  0x3b   :  { %650 = vmatpush3.msra.mxu1 %v181_v7  ;;  %658 = vmatprep.subr.mxu0 %v282_v10 }
  0x3c   :  { %659 = vmatpush3.msra.mxu0 %v282_v10  ;;  %665 = vmatprep.subr.mxu1 %v385_v21 }
  0x3d   :  { %660 = vmatprep.subr.mxu0 %v281_v11 }
  0x3e   :  { %661 = vmatpush3.msra.mxu0 %v281_v11 }
  0x3f   :  { %676 = vmatprep.subr.mxu0 %v478_v27 }
  0xf6   :  { %v642_v13 = vpop.f32.mrf.mxu0 }
  0xf7   :  { %v172_v14 = vadd.f32 %v642_v13, %v591_v12 }
  0xf8   :  { %v166_v15 = vpop.f32.mrf.mxu0 }
  0xf9   :  { %v167_v16 = vadd.f32 %v591_v12, %v166_v15  ;;  %v178_v17 = vmul.f32 0.01, %v172_v14  ;;  %vm176_vm1 = vcmp.ge.f32.partialorder %v172_v14, 0.0 }
  0xfb   :  { %vm175_vm2 = vcmp.ge.f32.partialorder %v167_v16, 0.0  ;;  %v177_v18 = vmul.f32 0.01, %v167_v16  ;;  %v180_v20 = vsel %vm176_vm1, %v172_v14, %v178_v17 }
  0xfd   :  { %v179_v19 = vsel %vm175_vm2, %v167_v16, %v177_v18 }
  0xfe   :  { %293 = vrot.lane.b32.xlu0 %v179_v19, %s811_s21  ;;  %651 = vmatprep.mubr.msk.f32.mxu1 %vm192_vm3, %v179_v19 }
  0xff   :  { %652 = vmatmul.mubr.msk.f32.vlgmr.msra.gmra.mxu1 %vm192_vm3, %v180_v20 }
 0x100   :  { %666 = vmatpush3.msra.mxu1 %v385_v21 }
 0x101   :  { %667 = vmatprep.subr.mxu1 %v384_v22 }
 0x102   :  { %295 = vrot.lane.b32.xlu0 %v180_v20, %s811_s21  ;;  %668 = vmatpush3.msra.mxu1 %v384_v22 }
 0x103   :  { %669 = vmatprep.subr.mxu1 %v383_v23 }
 0x104   :  { %670 = vmatpush3.msra.mxu1 %v383_v23 }
 0x105   :  { %671 = vmatprep.subr.mxu1 %v382_v24 }
 0x106   :  { %672 = vmatpush3.msra.mxu1 %v382_v24 }
 0x170   :  { %v294_v25 = vpop.permute.xlu0 %293 }
 0x171   :  { %662 = vmatprep.mubr.msk.f32.mxu0 %vm192_vm3, %v294_v25 }
 0x174   :  { %v296_v26 = vpop.permute.xlu0 %295 }
 0x175   :  { %663 = vmatmul.mubr.msk.f32.vlgmr.msra.gmra.mxu0 %vm192_vm3, %v296_v26 }
 0x176   :  { %677 = vmatpush3.msra.mxu0 %v478_v27 }
 0x177   :  { %678 = vmatprep.subr.mxu0 %v477_v28 }
 0x178   :  { %679 = vmatpush3.msra.mxu0 %v477_v28 }
 0x179   :  { %680 = vmatprep.subr.mxu0 %v476_v29 }
 0x17a   :  { %681 = vmatpush3.msra.mxu0 %v476_v29 }
 0x17b   :  { %682 = vmatprep.subr.mxu0 %v475_v30 }
 0x17c   :  { %683 = vmatpush3.msra.mxu0 %v475_v30 }
 0x1bf   :  { %v653_v32 = vpop.f32.mrf.mxu1 }
 0x1c0   :  { %v271_v33 = vadd.f32 %v653_v32, %v594_v31 }
 0x1c1   :  { %v265_v34 = vpop.f32.mrf.mxu1 }
 0x1c2   :  { %v266_v35 = vadd.f32 %v594_v31, %v265_v34  ;;  %v277_v36 = vmul.f32 0.01, %v271_v33  ;;  %vm275_vm4 = vcmp.ge.f32.partialorder %v271_v33, 0.0 }
 0x1c4   :  { %vm274_vm5 = vcmp.ge.f32.partialorder %v266_v35, 0.0  ;;  %v276_v37 = vmul.f32 0.01, %v266_v35  ;;  %v279_v39 = vsel %vm275_vm4, %v271_v33, %v277_v36 }
 0x1c6   :  { %v278_v38 = vsel %vm274_vm5, %v266_v35, %v276_v37 }
 0x1c7   :  { %673 = vmatprep.mubr.msk.f32.mxu1 %vm192_vm3, %v278_v38 }
 0x1c8   :  { %674 = vmatmul.mubr.msk.f32.vlgmr.msra.gmra.mxu1 %vm192_vm3, %v279_v39 }
 0x235   :  { %v664_v41 = vpop.f32.mrf.mxu0 }
 0x236   :  { %v373_v42 = vadd.f32 %v664_v41, %v598_v40 }
 0x237   :  { %v367_v43 = vpop.f32.mrf.mxu0 }
 0x238   :  { %v368_v44 = vadd.f32 %v598_v40, %v367_v43  ;;  %v379_v45 = vmul.f32 0.01, %v373_v42  ;;  %vm377_vm6 = vcmp.ge.f32.partialorder %v373_v42, 0.0 }
 0x23a   :  { %vm376_vm7 = vcmp.ge.f32.partialorder %v368_v44, 0.0  ;;  %v378_v46 = vmul.f32 0.01, %v368_v44  ;;  %v381_v48 = vsel %vm377_vm6, %v373_v42, %v379_v45 }
 0x23c   :  { %v380_v47 = vsel %vm376_vm7, %v368_v44, %v378_v46 }
 0x23d   :  { %684 = vmatprep.mubr.msk.f32.mxu0 %vm192_vm3, %v380_v47 }
 0x23e   :  { %685 = vmatmul.mubr.msk.f32.vlgmr.msra.gmra.mxu0 %vm192_vm3, %v381_v48 }
 0x288   :  { %v675_v50 = vpop.f32.mrf.mxu1 }
 0x289   :  { %v471_v51 = vadd.f32 %v675_v50, %v601_v49 }
 0x28a   :  { %v465_v52 = vpop.f32.mrf.mxu1 }
 0x28b   :  { %569 = vst [vmem:[#allocation10 + $0x10] sm:$0xff] %v471_v51  ;;  %v466_v53 = vadd.f32 %v601_v49, %v465_v52 }
 0x28d   :  { %568 = vst [vmem:[#allocation10] sm:$0xff] %v466_v53 }
 0x2fe   :  { %v686_v55 = vpop.f32.mrf.mxu0 }
 0x2ff   :  { %v565_v56 = vadd.f32 %v686_v55, %v605_v54 }
 0x300   :  { %v559_v57 = vpop.f32.mrf.mxu0 }
 0x301   :  { %571 = vst [vmem:[#allocation10 + $0x18] sm:$0xff] %v565_v56  ;;  %v560_v58 = vadd.f32 %v605_v54, %v559_v57 }
 0x303   :  { %570 = vst [vmem:[#allocation10 + $0x8] sm:$0xff] %v560_v58 }
 0x304   :  { %788 = shalt.err (!%p785_p10)
}
 0x305   :  { %s813_s8 = smov 256   ;;  %s814_s9 = smov 16  }
 0x306   :  { %583 = dma.vmem_to_hbm [thread:$0]  %s578_s29, 512, %s912_s7, [#allocation4], %s813_s8, %s813_s8, %s814_s9  }
 0x307   :  { %803 = dma.done.wait [#allocation4], 512  }
 0x308   :  { %804 = vsyncadd [#allocation4], 4294966784 }
 0x309   :  { %587 = vsyncpa [#allocation3], 1 }
 0x30a   :  { %588 = vsyncpa [#allocation6], 1 }
 0x30b   :  { %589 = vsyncpa [#allocation9], 1 }
 0x30c   :  { %590 = vsyncpa [#allocation4], 1 }

</bundles_post_ra>
